<compile_context>
chip_gen: v6e
topology: v6e:2x2x1
jax: 0.10.0
libtpu: 0.0.40
codegen_flags: <defaults>
</compile_context>

<pallas_src>
import functools
import math

import jax
import jax.numpy as jnp
from jax.experimental import pallas as pl
from jax.experimental.pallas import tpu as pltpu


def _mlp_decoder_kernel(n_layers, adj_block_ref, z_ref, wa_ref, *refs):
    # refs = (w_0, b_0, w_1, b_1, ..., w_{L-1}, b_{L-1}, out_ref)
    out_ref = refs[-1]
    param_refs = refs[:-1]

    wa = wa_ref[...]                              # (1, Z), broadcasts over rows
    x = z_ref[...] + wa                           # (B*D, Z) flattened slab

    # mat_z = adj_norm @ (z + Wa) - Wa, applied per batch element via the
    # block-diagonal kron(I_B, adj_norm) matrix -> one MXU push for all B.
    x = jnp.dot(adj_block_ref[...], x, preferred_element_type=jnp.float32) - wa

    # Full MLP over all B*D rows at once.
    for i in range(n_layers):
        w = param_refs[2 * i][...]                # (in_i, out_i)
        b = param_refs[2 * i + 1][...]            # (1, out_i)
        x = jnp.dot(x, w, preferred_element_type=jnp.float32) + b
        if i < n_layers - 1:                      # ReLU on all but the last layer
            x = jnp.maximum(x, 0.0)

    out_ref[...] = x.astype(out_ref.dtype)        # single (B*D, n_out) store


def mlp_decoder_forward(input_z, origin_A, Wa, weights, biases):
    """Pallas forward for MLPDecoder.

    input_z : [B, D, Z] float32
    origin_A: [D, D]    float32
    Wa      : [Z]       float32  (broadcasts over batch & nodes, as in torch)
    weights : list of [out_i, in_i] arrays (PyTorch nn.Linear layout)
    biases  : list of [out_i] arrays
    """
    B, D, Z = input_z.shape
    n_layers = len(weights)
    n_out = weights[-1].shape[0]

    # TODO(synk): torch.inverse has no Pallas equivalent; tiny DxD inverse is
    # computed here in plain JAX glue before launching the kernel.
    adj_norm = jnp.linalg.inv(jnp.eye(D, dtype=origin_A.dtype) - origin_A.T)

    # Block-diagonal replication so the per-batch adj transform becomes a
    # single (B*D, B*D) @ (B*D, Z) matmul inside the kernel.
    adj_block = jnp.kron(jnp.eye(B, dtype=adj_norm.dtype), adj_norm)

    z_flat = input_z.reshape(B * D, Z)            # free, contiguous reshape
    wa2d = Wa.reshape(1, Z)

    params = []
    for w, b in zip(weights, biases):
        params.append(jnp.asarray(w).T)               # (in, out)
        params.append(jnp.asarray(b).reshape(1, -1))  # (1, out)

    def const_spec(shape):
        # Full-array block, single grid step.
        return pl.BlockSpec(shape, lambda i, _n=len(shape): (0,) * _n)

    in_specs = ([const_spec(adj_block.shape),
                 const_spec(z_flat.shape),
                 const_spec(wa2d.shape)]
                + [const_spec(p.shape) for p in params])
    out_spec = const_spec((B * D, n_out))

    # Advisory cost estimate for XLA's scheduler.
    layer_dims = [Z] + [int(w.shape[0]) for w in weights]
    flops = 2 * (B * D) * (B * D) * Z                 # block-diag adj matmul
    flops += sum(2 * (B * D) * fi * fo
                 for fi, fo in zip(layer_dims[:-1], layer_dims[1:]))
    bytes_accessed = 4 * (int(adj_block.size) + int(z_flat.size)
                          + int(wa2d.size)
                          + sum(int(p.size) for p in params)
                          + B * D * n_out)
    cost = pl.CostEstimate(flops=int(flops), transcendentals=0,
                           bytes_accessed=int(bytes_accessed))

    kernel = functools.partial(_mlp_decoder_kernel, n_layers)
    out_flat = pl.pallas_call(
        kernel,
        out_shape=jax.ShapeDtypeStruct((B * D, n_out), jnp.float32),
        grid=(1,),
        in_specs=in_specs,
        out_specs=out_spec,
        compiler_params=pltpu.CompilerParams(
            dimension_semantics=("arbitrary",)),
        cost_estimate=cost,
    )(adj_block, z_flat, wa2d, *params)

    return out_flat.reshape(B, D, n_out)


def _reference_forward(input_z, origin_A, Wa, weights, biases):
    """Pure-JAX reference mirroring the PyTorch forward."""
    D = origin_A.shape[0]
    adj_norm = jnp.linalg.inv(jnp.eye(D, dtype=origin_A.dtype) - origin_A.T)
    x = jnp.einsum("ij,bjz->biz", adj_norm, input_z + Wa) - Wa
    for i, (w, b) in enumerate(zip(weights, biases)):
        x = x @ w.T + b
        if i < len(weights) - 1:
            x = jax.nn.relu(x)
    return x


if __name__ == "__main__":
    key = jax.random.PRNGKey(0)
    B, D, Z = 2, 8, 16          # batch, num graph nodes, n_in_z
    hidden_layers = [32, 32]
    n_out = 16

    keys = jax.random.split(key, 4 + len(hidden_layers) + 1)
    input_z = jax.random.normal(keys[0], (B, D, Z), dtype=jnp.float32)
    # Small-magnitude A so (I - A^T) is well conditioned.
    origin_A = 0.1 * jax.random.normal(keys[1], (D, D), dtype=jnp.float32)
    Wa = 0.05 * jax.random.normal(keys[2], (Z,), dtype=jnp.float32)

    # Deterministic Xavier-normal weights, zero biases (matches init_weights()).
    dims = [Z] + hidden_layers + [n_out]
    weights, biases = [], []
    for i, (fan_in, fan_out) in enumerate(zip(dims[:-1], dims[1:])):
        std = math.sqrt(2.0 / (fan_in + fan_out))
        w = std * jax.random.normal(keys[3 + i], (fan_out, fan_in),
                                    dtype=jnp.float32)
        weights.append(w)
        biases.append(jnp.zeros((fan_out,), dtype=jnp.float32))

    pred = mlp_decoder_forward(input_z, origin_A, Wa, weights, biases)
    pred = jax.block_until_ready(pred)

    ref = _reference_forward(input_z, origin_A, Wa, weights, biases)
    assert pred.shape == (B, D, n_out)
    assert jnp.allclose(pred, ref, atol=1e-4, rtol=1e-4), float(
        jnp.max(jnp.abs(pred - ref)))
    print("KERNEL_OK")
</pallas_src>

<mosaic_0001>
module attributes {stable_mosaic.version = 11 : i64} {
  func.func @_mlp_decoder_kernel(%arg0: i32, %arg1: memref<16x16xf32, #tpu.memory_space<vmem>>, %arg2: memref<16x16xf32, #tpu.memory_space<vmem>>, %arg3: memref<1x16xf32, #tpu.memory_space<vmem>>, %arg4: memref<16x32xf32, #tpu.memory_space<vmem>>, %arg5: memref<1x32xf32, #tpu.memory_space<vmem>>, %arg6: memref<32x32xf32, #tpu.memory_space<vmem>>, %arg7: memref<1x32xf32, #tpu.memory_space<vmem>>, %arg8: memref<32x16xf32, #tpu.memory_space<vmem>>, %arg9: memref<1x16xf32, #tpu.memory_space<vmem>>, %arg10: memref<16x16xf32, #tpu.memory_space<vmem>>) attributes {dimension_semantics = [#tpu.dimension_semantics<arbitrary>], iteration_bounds = array<i64: 1>, scalar_prefetch = 0 : i64, scratch_operands = 0 : i64, tpu.core_type = #tpu.core_type<tc>, window_params = [{pipeline_mode = #tpu.pipeline_mode<synchronous>, transform_indices = @transform_0, window_bounds = array<i64: 16, 16>}, {pipeline_mode = #tpu.pipeline_mode<synchronous>, transform_indices = @transform_1, window_bounds = array<i64: 16, 16>}, {pipeline_mode = #tpu.pipeline_mode<synchronous>, transform_indices = @transform_2, window_bounds = array<i64: 1, 16>}, {pipeline_mode = #tpu.pipeline_mode<synchronous>, transform_indices = @transform_3, window_bounds = array<i64: 16, 32>}, {pipeline_mode = #tpu.pipeline_mode<synchronous>, transform_indices = @transform_4, window_bounds = array<i64: 1, 32>}, {pipeline_mode = #tpu.pipeline_mode<synchronous>, transform_indices = @transform_5, window_bounds = array<i64: 32, 32>}, {pipeline_mode = #tpu.pipeline_mode<synchronous>, transform_indices = @transform_6, window_bounds = array<i64: 1, 32>}, {pipeline_mode = #tpu.pipeline_mode<synchronous>, transform_indices = @transform_7, window_bounds = array<i64: 32, 16>}, {pipeline_mode = #tpu.pipeline_mode<synchronous>, transform_indices = @transform_8, window_bounds = array<i64: 1, 16>}, {pipeline_mode = #tpu.pipeline_mode<synchronous>, transform_indices = @transform_9, window_bounds = array<i64: 16, 16>}]} {
    %c0 = arith.constant 0 : index
    %c0_0 = arith.constant 0 : index
    %0 = vector.load %arg3[%c0, %c0_0] : memref<1x16xf32, #tpu.memory_space<vmem>>, vector<1x16xf32>
    %c0_1 = arith.constant 0 : index
    %c0_2 = arith.constant 0 : index
    %1 = vector.load %arg2[%c0_1, %c0_2] : memref<16x16xf32, #tpu.memory_space<vmem>>, vector<16x16xf32>
    %2 = vector.broadcast %0 : vector<1x16xf32> to vector<16x16xf32>
    %3 = arith.addf %1, %2 : vector<16x16xf32>
    %c0_3 = arith.constant 0 : index
    %c0_4 = arith.constant 0 : index
    %4 = vector.load %arg1[%c0_3, %c0_4] : memref<16x16xf32, #tpu.memory_space<vmem>>, vector<16x16xf32>
    %cst = arith.constant dense<0.000000e+00> : vector<16x16xf32>
    %5 = tpu.matmul %4, %3, %cst {dimension_numbers = #tpu.dot_dimension_numbers<[1], [0], [0], [1], [0, 0, 1, 1], [], []>} : vector<16x16xf32>, vector<16x16xf32>, vector<16x16xf32> -> vector<16x16xf32>
    %6 = vector.broadcast %0 : vector<1x16xf32> to vector<16x16xf32>
    %7 = arith.subf %5, %6 : vector<16x16xf32>
    %c0_5 = arith.constant 0 : index
    %c0_6 = arith.constant 0 : index
    %8 = vector.load %arg4[%c0_5, %c0_6] : memref<16x32xf32, #tpu.memory_space<vmem>>, vector<16x32xf32>
    %c0_7 = arith.constant 0 : index
    %c0_8 = arith.constant 0 : index
    %9 = vector.load %arg5[%c0_7, %c0_8] : memref<1x32xf32, #tpu.memory_space<vmem>>, vector<1x32xf32>
    %cst_9 = arith.constant dense<0.000000e+00> : vector<16x32xf32>
    %10 = tpu.matmul %7, %8, %cst_9 {dimension_numbers = #tpu.dot_dimension_numbers<[1], [0], [0], [1], [0, 0, 1, 1], [], []>} : vector<16x16xf32>, vector<16x32xf32>, vector<16x32xf32> -> vector<16x32xf32>
    %11 = vector.broadcast %9 : vector<1x32xf32> to vector<16x32xf32>
    %12 = arith.addf %10, %11 : vector<16x32xf32>
    %cst_10 = arith.constant 0.000000e+00 : f32
    %13 = vector.broadcast %cst_10 : f32 to vector<16x32xf32>
    %14 = arith.maximumf %12, %13 : vector<16x32xf32>
    %c0_11 = arith.constant 0 : index
    %c0_12 = arith.constant 0 : index
    %15 = vector.load %arg6[%c0_11, %c0_12] : memref<32x32xf32, #tpu.memory_space<vmem>>, vector<32x32xf32>
    %c0_13 = arith.constant 0 : index
    %c0_14 = arith.constant 0 : index
    %16 = vector.load %arg7[%c0_13, %c0_14] : memref<1x32xf32, #tpu.memory_space<vmem>>, vector<1x32xf32>
    %cst_15 = arith.constant dense<0.000000e+00> : vector<16x32xf32>
    %17 = tpu.matmul %14, %15, %cst_15 {dimension_numbers = #tpu.dot_dimension_numbers<[1], [0], [0], [1], [0, 0, 1, 1], [], []>} : vector<16x32xf32>, vector<32x32xf32>, vector<16x32xf32> -> vector<16x32xf32>
    %18 = vector.broadcast %16 : vector<1x32xf32> to vector<16x32xf32>
    %19 = arith.addf %17, %18 : vector<16x32xf32>
    %cst_16 = arith.constant 0.000000e+00 : f32
    %20 = vector.broadcast %cst_16 : f32 to vector<16x32xf32>
    %21 = arith.maximumf %19, %20 : vector<16x32xf32>
    %c0_17 = arith.constant 0 : index
    %c0_18 = arith.constant 0 : index
    %22 = vector.load %arg8[%c0_17, %c0_18] : memref<32x16xf32, #tpu.memory_space<vmem>>, vector<32x16xf32>
    %c0_19 = arith.constant 0 : index
    %c0_20 = arith.constant 0 : index
    %23 = vector.load %arg9[%c0_19, %c0_20] : memref<1x16xf32, #tpu.memory_space<vmem>>, vector<1x16xf32>
    %cst_21 = arith.constant dense<0.000000e+00> : vector<16x16xf32>
    %24 = tpu.matmul %21, %22, %cst_21 {dimension_numbers = #tpu.dot_dimension_numbers<[1], [0], [0], [1], [0, 0, 1, 1], [], []>} : vector<16x32xf32>, vector<32x16xf32>, vector<16x16xf32> -> vector<16x16xf32>
    %25 = vector.broadcast %23 : vector<1x16xf32> to vector<16x16xf32>
    %26 = arith.addf %24, %25 : vector<16x16xf32>
    %c0_22 = arith.constant 0 : index
    %c0_23 = arith.constant 0 : index
    %27 = vector.load %arg10[%c0_22, %c0_23] : memref<16x16xf32, #tpu.memory_space<vmem>>, vector<16x16xf32>
    tpu.vector_store %arg10[%c0_22, %c0_23], %26 {strides = array<i32>} : memref<16x16xf32, #tpu.memory_space<vmem>>, vector<16x16xf32>,
    return
  }
  func.func @transform_0(%arg0: i32) -> (i32, i32) {
    %c0_i32 = arith.constant 0 : i32
    %c0_i32_0 = arith.constant 0 : i32
    %c0_i32_1 = arith.constant 0 : i32
    return %c0_i32, %c0_i32_0 : i32, i32
  }
  func.func @transform_1(%arg0: i32) -> (i32, i32) {
    %c0_i32 = arith.constant 0 : i32
    %c0_i32_0 = arith.constant 0 : i32
    %c0_i32_1 = arith.constant 0 : i32
    return %c0_i32, %c0_i32_0 : i32, i32
  }
  func.func @transform_2(%arg0: i32) -> (i32, i32) {
    %c0_i32 = arith.constant 0 : i32
    %c0_i32_0 = arith.constant 0 : i32
    %c0_i32_1 = arith.constant 0 : i32
    return %c0_i32, %c0_i32_0 : i32, i32
  }
  func.func @transform_3(%arg0: i32) -> (i32, i32) {
    %c0_i32 = arith.constant 0 : i32
    %c0_i32_0 = arith.constant 0 : i32
    %c0_i32_1 = arith.constant 0 : i32
    return %c0_i32, %c0_i32_0 : i32, i32
  }
  func.func @transform_4(%arg0: i32) -> (i32, i32) {
    %c0_i32 = arith.constant 0 : i32
    %c0_i32_0 = arith.constant 0 : i32
    %c0_i32_1 = arith.constant 0 : i32
    return %c0_i32, %c0_i32_0 : i32, i32
  }
  func.func @transform_5(%arg0: i32) -> (i32, i32) {
    %c0_i32 = arith.constant 0 : i32
    %c0_i32_0 = arith.constant 0 : i32
    %c0_i32_1 = arith.constant 0 : i32
    return %c0_i32, %c0_i32_0 : i32, i32
  }
  func.func @transform_6(%arg0: i32) -> (i32, i32) {
    %c0_i32 = arith.constant 0 : i32
    %c0_i32_0 = arith.constant 0 : i32
    %c0_i32_1 = arith.constant 0 : i32
    return %c0_i32, %c0_i32_0 : i32, i32
  }
  func.func @transform_7(%arg0: i32) -> (i32, i32) {
    %c0_i32 = arith.constant 0 : i32
    %c0_i32_0 = arith.constant 0 : i32
    %c0_i32_1 = arith.constant 0 : i32
    return %c0_i32, %c0_i32_0 : i32, i32
  }
  func.func @transform_8(%arg0: i32) -> (i32, i32) {
    %c0_i32 = arith.constant 0 : i32
    %c0_i32_0 = arith.constant 0 : i32
    %c0_i32_1 = arith.constant 0 : i32
    return %c0_i32, %c0_i32_0 : i32, i32
  }
  func.func @transform_9(%arg0: i32) -> (i32, i32) {
    %c0_i32 = arith.constant 0 : i32
    %c0_i32_0 = arith.constant 0 : i32
    %c0_i32_1 = arith.constant 0 : i32
    return %c0_i32, %c0_i32_0 : i32, i32
  }
}

</mosaic_0001>

<bundles_post_ra>
// kernel: tpu_custom_call.1
= control target key start
LH: loop header
LB: loop body
LE: loop exit
PB: predicated region body
PF: predicated region fallthrough
CT: control target
= control target key end

     0   :  { %14 = vsyncpa [#allocation3], 0  ;;  %s721_s0 = inlined_call_operand.vmem [shape: f32[16,16], index: 0, kind: input, shape index: {}]   ;;  %s722_s1 = inlined_call_operand.hbm [shape: f32[16,16], index: 1, kind: input, shape index: {}]   ;;  %s723_s2 = inlined_call_operand.vmem [shape: f32[1,16], index: 2, kind: input, shape index: {}]   ;;  %s724_s3 = inlined_call_operand.hbm [shape: f32[16,32], index: 3, kind: input, shape index: {}]   ;;  %s725_s4 = inlined_call_operand.vmem [shape: f32[1,32], index: 4, kind: input, shape index: {}]   ;;  %s726_s5 = inlined_call_operand.vmem [shape: f32[32,32], index: 5, kind: input, shape index: {}]   ;;  %s727_s6 = inlined_call_operand.vmem [shape: f32[1,32], index: 6, kind: input, shape index: {}]   ;;  %s728_s7 = inlined_call_operand.vmem [shape: f32[32,16], index: 7, kind: input, shape index: {}]   ;;  %s729_s8 = inlined_call_operand.vmem [shape: f32[1,16], index: 8, kind: input, shape index: {}]   ;;  %s730_s9 = inlined_call_operand.hbm [shape: f32[16,16], index: 9, kind: output, shape index: {}]  }
   0x1   :  { %15 = vsyncpa [#allocation6], 0 }
   0x2   :  { %16 = vsyncpa [#allocation4], 0  ;;  %s596_s30 = smov [#allocation2]  }
   0x3   :  { %s24_s10 = sshll.u32 %s596_s30, 4  ;;  %s25_s10 = int_to_ptr.vmem [resolvable:$true] %s24_s10 }
   0x4   :  { %s538_s11 = scalar_lea.vmem %s25_s10, 256  ;;  %p543_p1 = scmp.lt.s32.totalorder %s25_s10, %s25_s10 }
   0x5   :  { %p539_p0 = scmp.ne.s32.totalorder %s25_s10, %s538_s11  ;;  %p544_p2 = scmp.lt.s32.totalorder %s538_s11, %s538_s11 }
   0x7   :  { %p545_p3 = por %p544_p2, %p543_p1 }
   0x9   :  { %p546_p4 = pnand %p545_p3, %p539_p0 }
   0xb   :  { %549 = shalt.err (!%p546_p4)
}
   0xc   :  { %s597_s12 = smov 128   ;;  %s598_s13 = smov 8  }
   0xd   :  { %30 = dma.hbm_to_vmem [thread:$0]  %s722_s1, 256, %s25_s10, [#allocation3], %s597_s12, %s597_s12, %s598_s13  }
   0xe   :  { %s599_s16 = smov [#allocation5]  }
   0xf   :  { %s38_s17 = sshll.u32 %s599_s16, 4  ;;  %s39_s17 = int_to_ptr.vmem [resolvable:$true] %s38_s17 }
  0x10   :  { %s558_s18 = scalar_lea.vmem %s39_s17, 256  ;;  %p563_p6 = scmp.lt.s32.totalorder %s39_s17, %s39_s17 }
  0x11   :  { %p559_p5 = scmp.ne.s32.totalorder %s39_s17, %s558_s18  ;;  %p564_p7 = scmp.lt.s32.totalorder %s558_s18, %s558_s18 }
  0x13   :  { %p565_p8 = por %p564_p7, %p563_p6 }
  0x15   :  { %p566_p9 = pnand %p565_p8, %p559_p5 }
  0x17   :  { %569 = shalt.err (!%p566_p9)
}
  0x18   :  { %44 = dma.hbm_to_vmem [thread:$0]  %s724_s3, 256, %s39_s17, [#allocation6], %s597_s12, %s597_s12, %s598_s13  }
  0x19   :  { %590 = dma.done.wait [#allocation3], 256  }
  0x1a   :  { %591 = vsyncadd [#allocation3], 4294967040 }
  0x1b   :  { %592 = dma.done.wait [#allocation6], 256  }
  0x1c   :  { %593 = vsyncadd [#allocation6], 4294967040  ;;  %vm74_vm0 = vcmask 130048   ;;  %v457_v0 = vld [vmem:[%s723_s2] ss:$0 sm:$0xff]  ;;  %v63_v1 = vld [vmem:[#allocation2 + $0x8] sm:$0xff] }
  0x1d   :  { %v62_v2 = vld [vmem:[#allocation2] sm:$0xff]  ;;  %v71_v3 = vadd.f32 %v457_v0, %v63_v1  ;;  %v73_v6 = vld [vmem:[%s721_s0 + $0x8] sm:$0xff]  ;;  %v159_v7 = vld [vmem:[#allocation5 + $0x8] sm:$0xff]  ;;  %vm261_vm1 = vcmask 261120  }
  0x1e   :  { %v70_v4 = vadd.f32 %v457_v0, %v62_v2  ;;  %v72_v5 = vld [vmem:[%s721_s0] sm:$0xff]  ;;  %496 = vmatprep.subr.mxu1 %v159_v7  ;;  %v158_v8 = vld [vmem:[#allocation5] sm:$0xff]  ;;  %v253_v13 = vld [vmem:[%s726_s5 + $0x18] sm:$0xff] }
  0x1f   :  { %493 = vmatprep.mubr.msk.f32.mxu0 %vm74_vm0, %v72_v5  ;;  %489 = vmatprep.subr.mxu0 %v71_v3  ;;  %v252_v14 = vld [vmem:[%s726_s5 + $0x10] sm:$0xff]  ;;  %v251_v15 = vld [vmem:[%s726_s5 + $0x8] sm:$0xff]  ;;  %v250_v16 = vld [vmem:[%s726_s5] sm:$0xff] }
  0x20   :  { %490 = vmatpush3.msra.mxu0 %v71_v3  ;;  %497 = vmatpush3.msra.mxu1 %v159_v7  ;;  %v460_v17 = vld [vmem:[%s725_s4] ss:$0 sm:$0xff]  ;;  %v348_v24 = vld [vmem:[%s728_s7 + $0x18] sm:$0xff]  ;;  %v347_v25 = vld [vmem:[%s728_s7 + $0x10] sm:$0xff] }
  0x21   :  { %491 = vmatprep.subr.mxu0 %v70_v4  ;;  %498 = vmatprep.subr.mxu1 %v158_v8  ;;  %v346_v26 = vld [vmem:[%s728_s7 + $0x8] sm:$0xff]  ;;  %v345_v27 = vld [vmem:[%s728_s7] sm:$0xff]  ;;  %s600_s7 = smov [#allocation7]  }
  0x22   :  { %492 = vmatpush3.msra.mxu0 %v70_v4  ;;  %499 = vmatpush3.msra.mxu1 %v158_v8  ;;  %v463_v28 = vld [vmem:[%s727_s6] ss:$0 sm:$0xff]  ;;  %s444_s23 = sshll.u32 %s600_s7, 4  ;;  %s445_s23 = int_to_ptr.vmem [resolvable:$true] %s444_s23 }
  0x23   :  { %494 = vmatmul.mubr.msk.f32.vlgmr.msra.gmra.mxu0 %vm74_vm0, %v73_v6  ;;  %503 = vmatprep.subr.mxu0 %v253_v13  ;;  %v466_v35 = vld [vmem:[%s729_s8] ss:$0 sm:$0xff]  ;;  %s570_s6 = scalar_lea.vmem %s445_s23, 256  ;;  %p575_p11 = scmp.lt.s32.totalorder %s445_s23, %s445_s23 }
  0x24   :  { %504 = vmatpush3.msra.mxu0 %v253_v13  ;;  %514 = vmatprep.subr.mxu1 %v348_v24  ;;  %p571_p10 = scmp.ne.s32.totalorder %s445_s23, %s570_s6  ;;  %p576_p12 = scmp.lt.s32.totalorder %s570_s6, %s570_s6 }
  0x25   :  { %505 = vmatprep.subr.mxu0 %v252_v14 }
  0x26   :  { %506 = vmatpush3.msra.mxu0 %v252_v14  ;;  %p577_p13 = por %p576_p12, %p575_p11 }
  0x27   :  { %507 = vmatprep.subr.mxu0 %v251_v15 }
  0x28   :  { %508 = vmatpush3.msra.mxu0 %v251_v15  ;;  %p578_p0 = pnand %p577_p13, %p571_p10 }
  0x29   :  { %509 = vmatprep.subr.mxu0 %v250_v16 }
  0x2a   :  { %510 = vmatpush3.msra.mxu0 %v250_v16 }
  0xe3   :  { %v495_v9 = vpop.f32.mrf.mxu0 }
  0xe4   :  { %v157_v12 = vsub.f32 %v495_v9, %v457_v0 }
  0xe5   :  { %v147_v10 = vpop.f32.mrf.mxu0 }
  0xe6   :  { %v156_v11 = vsub.f32 %v147_v10, %v457_v0 }
  0xe8   :  { %500 = vmatprep.mubr.msk.f32.mxu1 %vm74_vm0, %v156_v11 }
  0xe9   :  { %501 = vmatmul.mubr.msk.f32.vlgmr.msra.gmra.mxu1 %vm74_vm0, %v157_v12 }
  0xea   :  { %515 = vmatpush3.msra.mxu1 %v348_v24 }
  0xeb   :  { %516 = vmatprep.subr.mxu1 %v347_v25 }
  0xec   :  { %517 = vmatpush3.msra.mxu1 %v347_v25 }
  0xed   :  { %518 = vmatprep.subr.mxu1 %v346_v26 }
  0xee   :  { %519 = vmatpush3.msra.mxu1 %v346_v26 }
  0xef   :  { %520 = vmatprep.subr.mxu1 %v345_v27 }
  0xf0   :  { %521 = vmatpush3.msra.mxu1 %v345_v27 }
 0x1a9   :  { %v502_v18 = vpop.f32.mrf.mxu1 }
 0x1aa   :  { %v245_v19 = vadd.f32 %v502_v18, %v460_v17 }
 0x1ab   :  { %v239_v20 = vpop.f32.mrf.mxu1 }
 0x1ac   :  { %v240_v21 = vadd.f32 %v460_v17, %v239_v20  ;;  %v249_v23 = vmax.f32 %v245_v19, 0.0 }
 0x1ae   :  { %v248_v22 = vmax.f32 %v240_v21, 0.0 }
 0x1b0   :  { %511 = vmatprep.mubr.msk.f32.mxu0 %vm261_vm1, %v248_v22 }
 0x1b1   :  { %512 = vmatmul.mubr.msk.f32.vlgmr.msra.gmra.mxu0 %vm261_vm1, %v249_v23 }
 0x271   :  { %v513_v29 = vpop.f32.mrf.mxu0 }
 0x272   :  { %v340_v30 = vadd.f32 %v513_v29, %v463_v28 }
 0x273   :  { %v334_v31 = vpop.f32.mrf.mxu0 }
 0x274   :  { %v335_v32 = vadd.f32 %v463_v28, %v334_v31  ;;  %v344_v34 = vmax.f32 %v340_v30, 0.0 }
 0x276   :  { %v343_v33 = vmax.f32 %v335_v32, 0.0 }
 0x278   :  { %522 = vmatprep.mubr.msk.f32.mxu1 %vm261_vm1, %v343_v33 }
 0x279   :  { %523 = vmatmul.mubr.msk.f32.vlgmr.msra.gmra.mxu1 %vm261_vm1, %v344_v34 }
 0x339   :  { %v524_v36 = vpop.f32.mrf.mxu1 }
 0x33a   :  { %v434_v37 = vadd.f32 %v524_v36, %v466_v35 }
 0x33b   :  { %v428_v38 = vpop.f32.mrf.mxu1 }
 0x33c   :  { %438 = vst.msk [vmem:[#allocation7 + $0x8] sm:$0xff] %vm74_vm0, %v434_v37  ;;  %v429_v39 = vadd.f32 %v466_v35, %v428_v38 }
 0x33e   :  { %437 = vst.msk [vmem:[#allocation7] sm:$0xff] %vm74_vm0, %v429_v39 }
 0x33f   :  { %581 = shalt.err (!%p578_p0)
}
 0x340   :  { %450 = dma.vmem_to_hbm [thread:$0]  %s445_s23, 256, %s730_s9, [#allocation4], %s597_s12, %s597_s12, %s598_s13  }
 0x341   :  { %594 = dma.done.wait [#allocation4], 256  }
 0x342   :  { %595 = vsyncadd [#allocation4], 4294967040 }
 0x343   :  { %454 = vsyncpa [#allocation3], 1 }
 0x344   :  { %455 = vsyncpa [#allocation6], 1 }
 0x345   :  { %456 = vsyncpa [#allocation4], 1 }

</bundles_post_ra>
